<compile_context>
chip_gen: v6e
topology: v6e:2x2x1
jax: 0.10.0
libtpu: 0.0.40
codegen_flags: <defaults>
</compile_context>

<pallas_src>
import functools

import jax
import jax.numpy as jnp
from jax.experimental import pallas as pl
from jax.experimental.pallas import tpu as pltpu


# ----------------------------------------------------------------------------
# helpers
# ----------------------------------------------------------------------------
_XW_RESIDENT_BYTES = 8 << 20      # keep XW/HW fully VMEM-resident up to 8 MiB


def _round_up(x, m):
    return ((x + m - 1) // m) * m


def _pick_tiles(n_pad, max_tile=1024):
    """(tile_m, tile_k): multiples of 128 dividing n_pad.

    tile_k grows up to max_tile (amortizes per-grid-step overhead, doubles
    per-row DMA contiguity).  tile_m is capped at n_pad//2 when possible so
    the 'parallel' row axis keeps >=2 tiles for v7x's two TensorCores (no
    effect on single-TC v5e/v6e).
    """
    def largest_divisor(cap):
        best = 128
        cand = 128
        while cand <= min(cap, n_pad):
            if n_pad % cand == 0:
                best = cand
            cand += 128
        return best

    tile_k = largest_divisor(max_tile)
    if n_pad >= 256:
        tile_m = largest_divisor(min(max_tile, n_pad // 2))
    else:
        tile_m = n_pad
    return tile_m, tile_k


def _vmem_limit_bytes(tile_m, tile_k, n_pad, f_in, f_out, out_itemsize,
                      xw_resident, has_wcat):
    a_bytes = 2 * tile_m * tile_k * 2                          # bf16, 2 bufs
    xw_bytes = (2 * n_pad * f_in * 2) if xw_resident else (2 * tile_k * f_in * 2)
    out_bytes = 2 * tile_m * f_out * out_itemsize
    acc_bytes = tile_m * f_in * 4
    wcat_bytes = (2 * f_in * f_out * 2) if has_wcat else 0
    bias_bytes = 2 * f_out * 4
    need = a_bytes + xw_bytes + out_bytes + acc_bytes + wcat_bytes + bias_bytes
    # 50% headroom for compiler internals; floor/cap valid on every generation
    return int(min(max(need * 3 // 2 + (1 << 20), 32 << 20), 60 << 20))


# ----------------------------------------------------------------------------
# Aggregation kernel:  out = [relu](A_hat @ XW + b) [@ W2]
#   rows "parallel", node-reduction "arbitrary", f32 VMEM accumulator,
#   XW fully VMEM-resident (constant index map) when it fits the budget.
# ----------------------------------------------------------------------------
def _agg_body(a_ref, xw_ref, b_ref, o_ref, acc_ref, *, tile_k, xw_resident,
              apply_relu, wcat_ref):
    k = pl.program_id(1)

    @pl.when(k == 0)
    def _init():
        acc_ref[...] = jnp.zeros_like(acc_ref)

    if xw_resident:
        start = pl.multiple_of(k * tile_k, tile_k)
        xw_blk = xw_ref[pl.ds(start, tile_k), :]
    else:
        xw_blk = xw_ref[...]

    acc_ref[...] += jnp.dot(a_ref[...], xw_blk,
                            preferred_element_type=jnp.float32)

    @pl.when(k == pl.num_programs(1) - 1)
    def _finalize():
        out = acc_ref[...] + b_ref[...]                         # f32 epilogue
        if apply_relu:
            out = jnp.maximum(out, 0.0)
        if wcat_ref is not None:
            # fused layer-2 feature transform (MXU has slack: HBM-bound pass)
            out = jnp.dot(out.astype(wcat_ref.dtype), wcat_ref[...],
                          preferred_element_type=jnp.float32)
        o_ref[...] = out.astype(o_ref.dtype)


def _agg_fused_kernel(a_ref, xw_ref, b_ref, wcat_ref, o_ref, acc_ref, *,
                      tile_k, xw_resident, apply_relu):
    _agg_body(a_ref, xw_ref, b_ref, o_ref, acc_ref, tile_k=tile_k,
              xw_resident=xw_resident, apply_relu=apply_relu,
              wcat_ref=wcat_ref)


def _agg_plain_kernel(a_ref, xw_ref, b_ref, o_ref, acc_ref, *,
                      tile_k, xw_resident, apply_relu):
    _agg_body(a_ref, xw_ref, b_ref, o_ref, acc_ref, tile_k=tile_k,
              xw_resident=xw_resident, apply_relu=apply_relu,
              wcat_ref=None)


def aggregate(a_hat, xw, b2d, *, tile_m, tile_k, wcat=None, apply_relu,
              out_dtype):
    n_pad = a_hat.shape[0]
    f_in = xw.shape[1]
    f_out = wcat.shape[1] if wcat is not None else f_in
    out_itemsize = jnp.dtype(out_dtype).itemsize

    xw_resident = (n_pad * f_in * xw.dtype.itemsize) <= _XW_RESIDENT_BYTES
    if xw_resident:
        xw_spec = pl.BlockSpec((n_pad, f_in), lambda i, k: (0, 0))   # resident
    else:
        xw_spec = pl.BlockSpec((tile_k, f_in), lambda i, k: (k, 0))  # streamed

    in_specs = [
        pl.BlockSpec((tile_m, tile_k), lambda i, k: (i, k)),         # A_hat
        xw_spec,                                                     # XW
        pl.BlockSpec((1, b2d.shape[1]), lambda i, k: (0, 0)),        # bias
    ]
    args = [a_hat, xw, b2d]
    if wcat is not None:
        in_specs.append(pl.BlockSpec(wcat.shape, lambda i, k: (0, 0)))
        args.append(wcat)
        kernel = functools.partial(_agg_fused_kernel, tile_k=tile_k,
                                   xw_resident=xw_resident,
                                   apply_relu=apply_relu)
    else:
        kernel = functools.partial(_agg_plain_kernel, tile_k=tile_k,
                                   xw_resident=xw_resident,
                                   apply_relu=apply_relu)

    flops = 2 * n_pad * n_pad * f_in
    if wcat is not None:
        flops += 2 * n_pad * f_in * f_out
    bytes_acc = (a_hat.size * a_hat.dtype.itemsize
                 + xw.size * xw.dtype.itemsize
                 + n_pad * f_out * out_itemsize)
    vmem_limit = _vmem_limit_bytes(tile_m, tile_k, n_pad, f_in, f_out,
                                   out_itemsize, xw_resident, wcat is not None)

    return pl.pallas_call(
        kernel,
        out_shape=jax.ShapeDtypeStruct((n_pad, f_out), out_dtype),
        grid=(n_pad // tile_m, n_pad // tile_k),
        in_specs=in_specs,
        out_specs=pl.BlockSpec((tile_m, f_out), lambda i, k: (i, 0)),
        scratch_shapes=[pltpu.VMEM((tile_m, f_in), jnp.float32)],
        compiler_params=pltpu.CompilerParams(
            dimension_semantics=("parallel", "arbitrary"),
            vmem_limit_bytes=vmem_limit),
        cost_estimate=pl.CostEstimate(
            flops=flops, transcendentals=0, bytes_accessed=bytes_acc),
    )(*args)


# ----------------------------------------------------------------------------
# Glue: symmetrically-normalized adjacency, built directly at padded size and
# cast in one fused expression (padded rows/cols are exactly zero).
# ----------------------------------------------------------------------------
def build_norm_adj_padded(edge_index, num_nodes, n_pad, dtype=jnp.bfloat16):
    src = edge_index[0]
    dst = edge_index[1]
    a = jnp.zeros((n_pad, n_pad), jnp.float32)
    # edge (src -> dst): message flows j -> i  =>  A[i, j]
    a = a.at[dst, src].add(1.0)
    # add_remaining_self_loops: only add a self-loop where none exists yet,
    # and only for real (unpadded) nodes.
    idx = jnp.arange(n_pad)
    diag = jnp.diagonal(a)
    need_loop = (idx < num_nodes) & (diag <= 0.0)
    a = a.at[idx, idx].set(jnp.where(need_loop, 1.0, diag))
    deg = a.sum(axis=1)
    dinv = jnp.where(deg > 0.0, jax.lax.rsqrt(deg), 0.0)   # padded rows -> 0
    return (dinv[:, None] * a * dinv[None, :]).astype(dtype)


# ----------------------------------------------------------------------------
# VariationalGCNEncoder forward
# ----------------------------------------------------------------------------
def variational_gcn_encoder(params, x, edge_index):
    n = x.shape[0]
    hidden = params["w1"].shape[1]          # 128
    out_c = params["w_mu"].shape[1]

    n_pad = _round_up(n, 128)               # padding decoupled from tile size
    tile_m, tile_k = _pick_tiles(n_pad)

    a_pad = build_norm_adj_padded(edge_index, n, n_pad)        # bf16, padded

    # Layer-1 feature transform in plain XLA: (n x f_in x 128) is tiny and a
    # K=f_in Pallas matmul would waste the MXU + add a launch.
    x_pad = jnp.zeros((n_pad, x.shape[1]), x.dtype).at[:n].set(x)
    xw1 = (x_pad @ params["w1"]).astype(jnp.bfloat16)          # (n_pad, 128)

    # Fused mu|logstd weights / biases, padded to a lane-dense 128 multiple.
    f_out2 = 2 * out_c
    f_out2_pad = _round_up(f_out2, 128)
    w_cat = jnp.concatenate([params["w_mu"], params["w_ls"]], axis=1)
    w_cat_pad = jnp.zeros((hidden, f_out2_pad), jnp.bfloat16)
    w_cat_pad = w_cat_pad.at[:, :f_out2].set(w_cat.astype(jnp.bfloat16))
    b_cat_pad = jnp.zeros((1, f_out2_pad), jnp.float32)
    b_cat_pad = b_cat_pad.at[0, :f_out2].set(
        jnp.concatenate([params["b_mu"], params["b_ls"]]))
    b1 = params["b1"].reshape(1, hidden).astype(jnp.float32)

    # Pass 1 (fused): hw = relu(A_hat @ XW1 + b1) @ [Wmu|Wls]
    hw = aggregate(a_pad, xw1, b1, wcat=w_cat_pad, apply_relu=True,
                   tile_m=tile_m, tile_k=tile_k, out_dtype=jnp.bfloat16)

    # Pass 2: z = A_hat @ hw + [bmu|bls]
    z = aggregate(a_pad, hw, b_cat_pad, wcat=None, apply_relu=False,
                  tile_m=tile_m, tile_k=tile_k, out_dtype=jnp.float32)

    mu = z[:n, :out_c]
    logstd = z[:n, out_c:f_out2]
    return mu, logstd


def init_params(key, in_channels, hidden, out_channels):
    # Glorot-uniform weights (PyG GCNConv default), zero biases.
    def glorot(k, fan_in, fan_out):
        limit = jnp.sqrt(6.0 / (fan_in + fan_out))
        return jax.random.uniform(k, (fan_in, fan_out), jnp.float32,
                                  -limit, limit)

    k1, k2, k3 = jax.random.split(key, 3)
    return {
        "w1": glorot(k1, in_channels, hidden),
        "b1": jnp.zeros((hidden,), jnp.float32),
        "w_mu": glorot(k2, hidden, out_channels),
        "b_mu": jnp.zeros((out_channels,), jnp.float32),
        "w_ls": glorot(k3, hidden, out_channels),
        "b_ls": jnp.zeros((out_channels,), jnp.float32),
    }


if __name__ == "__main__":
    key = jax.random.PRNGKey(0)
    k_x, k_e, k_p = jax.random.split(key, 3)

    num_nodes = 16
    in_channels = 8
    hidden = 128          # fixed by the module definition
    out_channels = 16
    num_edges = 40

    x = jax.random.normal(k_x, (num_nodes, in_channels), jnp.float32)
    edge_index = jax.random.randint(k_e, (2, num_edges), 0, num_nodes,
                                    dtype=jnp.int32)
    params = init_params(k_p, in_channels, hidden, out_channels)

    fwd = jax.jit(variational_gcn_encoder)
    mu, logstd = fwd(params, x, edge_index)
    jax.block_until_ready((mu, logstd))

    # Sanity check against a plain-JAX f32 reference of the same math
    # (kernels use bf16 matmul operands with f32 accumulation -> loose tol).
    a_hat = build_norm_adj_padded(edge_index, num_nodes, num_nodes,
                                  dtype=jnp.float32)
    h_ref = jnp.maximum(a_hat @ (x @ params["w1"]) + params["b1"], 0.0)
    mu_ref = a_hat @ (h_ref @ params["w_mu"]) + params["b_mu"]
    ls_ref = a_hat @ (h_ref @ params["w_ls"]) + params["b_ls"]

    assert mu.shape == (num_nodes, out_channels)
    assert logstd.shape == (num_nodes, out_channels)
    assert jnp.allclose(mu, mu_ref, atol=5e-2, rtol=5e-2)
    assert jnp.allclose(logstd, ls_ref, atol=5e-2, rtol=5e-2)

    print("KERNEL_OK")
</pallas_src>

<mosaic_0001>
module attributes {stable_mosaic.version = 11 : i64} {
  func.func private @main(%arg0: i32) attributes {dimension_semantics = [#tpu.dimension_semantics<core_parallel>], iteration_bounds = array<i64: 2>, tpu.core_type = #tpu.core_type<sc_scalar_subcore>, window_params = []} {
    return
  }
}

module attributes {stable_mosaic.version = 11 : i64} {
  func.func private @main(%arg0: i32) attributes {dimension_semantics = [#tpu.dimension_semantics<core_parallel>], iteration_bounds = array<i64: 2>, tpu.core_type = #tpu.core_type<sc_scalar_subcore>, window_params = []} {
    return
  }
}

module attributes {stable_mosaic.version = 11 : i64} {
  func.func @_agg_plain_kernel(%arg0: i32, %arg1: i32, %arg2: memref<128x128xbf16, #tpu.memory_space<vmem>>, %arg3: memref<128x128xbf16, #tpu.memory_space<vmem>>, %arg4: memref<1x128xf32, #tpu.memory_space<vmem>>, %arg5: memref<128x128xf32, #tpu.memory_space<vmem>>, %arg6: memref<128x128xf32, #tpu.memory_space<vmem>>) attributes {dimension_semantics = [#tpu.dimension_semantics<parallel>, #tpu.dimension_semantics<arbitrary>], iteration_bounds = array<i64: 1, 1>, scalar_prefetch = 0 : i64, scratch_operands = 1 : i64, tpu.core_type = #tpu.core_type<tc>, window_params = [{transform_indices = @transform_0, window_bounds = array<i64: 128, 128>}, {pipeline_mode = #tpu.pipeline_mode<synchronous>, transform_indices = @transform_1, window_bounds = array<i64: 128, 128>}, {pipeline_mode = #tpu.pipeline_mode<synchronous>, transform_indices = @transform_2, window_bounds = array<i64: 1, 128>}, {transform_indices = @transform_3, window_bounds = array<i64: 128, 128>}]} {
    %c0_i32 = arith.constant 0 : i32
    %0 = arith.cmpi eq, %arg1, %c0_i32 : i32
    %1 = arith.extui %0 : i1 to i32
    %c0_i32_0 = arith.constant 0 : i32
    %2 = arith.cmpi ne, %1, %c0_i32_0 : i32
    scf.if %2 {
      %cst_9 = arith.constant 0.000000e+00 : f32
      %15 = vector.broadcast %cst_9 : f32 to vector<128x128xf32>
      %c0_10 = arith.constant 0 : index
      %c0_11 = arith.constant 0 : index
      %16 = vector.load %arg6[%c0_10, %c0_11] : memref<128x128xf32, #tpu.memory_space<vmem>>, vector<128x128xf32>
      tpu.vector_store %arg6[%c0_10, %c0_11], %15 {strides = array<i32>} : memref<128x128xf32, #tpu.memory_space<vmem>>, vector<128x128xf32>,
    } else {
    }
    %c128_i32 = arith.constant 128 : i32
    %3 = arith.muli %arg1, %c128_i32 : i32
    %4 = tpu.assume_multiple %3, 128 : i32
    %5 = arith.index_cast %4 : i32 to index
    %c0 = arith.constant 0 : index
    %6 = vector.load %arg3[%5, %c0] : memref<128x128xbf16, #tpu.memory_space<vmem>>, vector<128x128xbf16>
    %c0_1 = arith.constant 0 : index
    %c0_2 = arith.constant 0 : index
    %7 = vector.load %arg6[%c0_1, %c0_2] : memref<128x128xf32, #tpu.memory_space<vmem>>, vector<128x128xf32>
    %c0_3 = arith.constant 0 : index
    %c0_4 = arith.constant 0 : index
    %8 = vector.load %arg2[%c0_3, %c0_4] : memref<128x128xbf16, #tpu.memory_space<vmem>>, vector<128x128xbf16>
    %cst = arith.constant dense<0.000000e+00> : vector<128x128xf32>
    %9 = tpu.matmul %8, %6, %cst {dimension_numbers = #tpu.dot_dimension_numbers<[1], [0], [0], [1], [0, 0, 1, 1], [], []>} : vector<128x128xbf16>, vector<128x128xbf16>, vector<128x128xf32> -> vector<128x128xf32>
    %10 = arith.addf %7, %9 : vector<128x128xf32>
    %c0_5 = arith.constant 0 : index
    %c0_6 = arith.constant 0 : index
    %11 = vector.load %arg6[%c0_5, %c0_6] : memref<128x128xf32, #tpu.memory_space<vmem>>, vector<128x128xf32>
    tpu.vector_store %arg6[%c0_5, %c0_6], %10 {strides = array<i32>} : memref<128x128xf32, #tpu.memory_space<vmem>>, vector<128x128xf32>,
    %c0_i32_7 = arith.constant 0 : i32
    %12 = arith.cmpi eq, %arg1, %c0_i32_7 : i32
    %13 = arith.extui %12 : i1 to i32
    %c0_i32_8 = arith.constant 0 : i32
    %14 = arith.cmpi ne, %13, %c0_i32_8 : i32
    scf.if %14 {
      %c0_9 = arith.constant 0 : index
      %c0_10 = arith.constant 0 : index
      %15 = vector.load %arg6[%c0_9, %c0_10] : memref<128x128xf32, #tpu.memory_space<vmem>>, vector<128x128xf32>
      %c0_11 = arith.constant 0 : index
      %c0_12 = arith.constant 0 : index
      %16 = vector.load %arg4[%c0_11, %c0_12] : memref<1x128xf32, #tpu.memory_space<vmem>>, vector<1x128xf32>
      %17 = vector.broadcast %16 : vector<1x128xf32> to vector<128x128xf32>
      %18 = arith.addf %15, %17 : vector<128x128xf32>
      %c0_13 = arith.constant 0 : index
      %c0_14 = arith.constant 0 : index
      %19 = vector.load %arg5[%c0_13, %c0_14] : memref<128x128xf32, #tpu.memory_space<vmem>>, vector<128x128xf32>
      tpu.vector_store %arg5[%c0_13, %c0_14], %18 {strides = array<i32>} : memref<128x128xf32, #tpu.memory_space<vmem>>, vector<128x128xf32>,
    } else {
    }
    return
  }
  func.func @transform_0(%arg0: i32, %arg1: i32) -> (i32, i32) {
    %c0_i32 = arith.constant 0 : i32
    return %arg0, %arg1 : i32, i32
  }
  func.func @transform_1(%arg0: i32, %arg1: i32) -> (i32, i32) {
    %c0_i32 = arith.constant 0 : i32
    %c0_i32_0 = arith.constant 0 : i32
    %c0_i32_1 = arith.constant 0 : i32
    return %c0_i32, %c0_i32_0 : i32, i32
  }
  func.func @transform_2(%arg0: i32, %arg1: i32) -> (i32, i32) {
    %c0_i32 = arith.constant 0 : i32
    %c0_i32_0 = arith.constant 0 : i32
    %c0_i32_1 = arith.constant 0 : i32
    return %c0_i32, %c0_i32_0 : i32, i32
  }
  func.func @transform_3(%arg0: i32, %arg1: i32) -> (i32, i32) {
    %c0_i32 = arith.constant 0 : i32
    %c0_i32_0 = arith.constant 0 : i32
    return %arg0, %c0_i32 : i32, i32
  }
}

module attributes {stable_mosaic.version = 11 : i64} {
  func.func @_agg_fused_kernel(%arg0: i32, %arg1: i32, %arg2: memref<128x128xbf16, #tpu.memory_space<vmem>>, %arg3: memref<128x128xbf16, #tpu.memory_space<vmem>>, %arg4: memref<1x128xf32, #tpu.memory_space<vmem>>, %arg5: memref<128x128xbf16, #tpu.memory_space<vmem>>, %arg6: memref<128x128xbf16, #tpu.memory_space<vmem>>, %arg7: memref<128x128xf32, #tpu.memory_space<vmem>>) attributes {dimension_semantics = [#tpu.dimension_semantics<parallel>, #tpu.dimension_semantics<arbitrary>], iteration_bounds = array<i64: 1, 1>, scalar_prefetch = 0 : i64, scratch_operands = 1 : i64, tpu.core_type = #tpu.core_type<tc>, window_params = [{transform_indices = @transform_0, window_bounds = array<i64: 128, 128>}, {pipeline_mode = #tpu.pipeline_mode<synchronous>, transform_indices = @transform_1, window_bounds = array<i64: 128, 128>}, {pipeline_mode = #tpu.pipeline_mode<synchronous>, transform_indices = @transform_2, window_bounds = array<i64: 1, 128>}, {pipeline_mode = #tpu.pipeline_mode<synchronous>, transform_indices = @transform_3, window_bounds = array<i64: 128, 128>}, {transform_indices = @transform_4, window_bounds = array<i64: 128, 128>}]} {
    %c0_i32 = arith.constant 0 : i32
    %0 = arith.cmpi eq, %arg1, %c0_i32 : i32
    %1 = arith.extui %0 : i1 to i32
    %c0_i32_0 = arith.constant 0 : i32
    %2 = arith.cmpi ne, %1, %c0_i32_0 : i32
    scf.if %2 {
      %cst_9 = arith.constant 0.000000e+00 : f32
      %15 = vector.broadcast %cst_9 : f32 to vector<128x128xf32>
      %c0_10 = arith.constant 0 : index
      %c0_11 = arith.constant 0 : index
      %16 = vector.load %arg7[%c0_10, %c0_11] : memref<128x128xf32, #tpu.memory_space<vmem>>, vector<128x128xf32>
      tpu.vector_store %arg7[%c0_10, %c0_11], %15 {strides = array<i32>} : memref<128x128xf32, #tpu.memory_space<vmem>>, vector<128x128xf32>,
    } else {
    }
    %c128_i32 = arith.constant 128 : i32
    %3 = arith.muli %arg1, %c128_i32 : i32
    %4 = tpu.assume_multiple %3, 128 : i32
    %5 = arith.index_cast %4 : i32 to index
    %c0 = arith.constant 0 : index
    %6 = vector.load %arg3[%5, %c0] : memref<128x128xbf16, #tpu.memory_space<vmem>>, vector<128x128xbf16>
    %c0_1 = arith.constant 0 : index
    %c0_2 = arith.constant 0 : index
    %7 = vector.load %arg7[%c0_1, %c0_2] : memref<128x128xf32, #tpu.memory_space<vmem>>, vector<128x128xf32>
    %c0_3 = arith.constant 0 : index
    %c0_4 = arith.constant 0 : index
    %8 = vector.load %arg2[%c0_3, %c0_4] : memref<128x128xbf16, #tpu.memory_space<vmem>>, vector<128x128xbf16>
    %cst = arith.constant dense<0.000000e+00> : vector<128x128xf32>
    %9 = tpu.matmul %8, %6, %cst {dimension_numbers = #tpu.dot_dimension_numbers<[1], [0], [0], [1], [0, 0, 1, 1], [], []>} : vector<128x128xbf16>, vector<128x128xbf16>, vector<128x128xf32> -> vector<128x128xf32>
    %10 = arith.addf %7, %9 : vector<128x128xf32>
    %c0_5 = arith.constant 0 : index
    %c0_6 = arith.constant 0 : index
    %11 = vector.load %arg7[%c0_5, %c0_6] : memref<128x128xf32, #tpu.memory_space<vmem>>, vector<128x128xf32>
    tpu.vector_store %arg7[%c0_5, %c0_6], %10 {strides = array<i32>} : memref<128x128xf32, #tpu.memory_space<vmem>>, vector<128x128xf32>,
    %c0_i32_7 = arith.constant 0 : i32
    %12 = arith.cmpi eq, %arg1, %c0_i32_7 : i32
    %13 = arith.extui %12 : i1 to i32
    %c0_i32_8 = arith.constant 0 : i32
    %14 = arith.cmpi ne, %13, %c0_i32_8 : i32
    scf.if %14 {
      %c0_9 = arith.constant 0 : index
      %c0_10 = arith.constant 0 : index
      %15 = vector.load %arg7[%c0_9, %c0_10] : memref<128x128xf32, #tpu.memory_space<vmem>>, vector<128x128xf32>
      %c0_11 = arith.constant 0 : index
      %c0_12 = arith.constant 0 : index
      %16 = vector.load %arg4[%c0_11, %c0_12] : memref<1x128xf32, #tpu.memory_space<vmem>>, vector<1x128xf32>
      %17 = vector.broadcast %16 : vector<1x128xf32> to vector<128x128xf32>
      %18 = arith.addf %15, %17 : vector<128x128xf32>
      %cst_13 = arith.constant 0.000000e+00 : f32
      %19 = vector.broadcast %cst_13 : f32 to vector<128x128xf32>
      %20 = arith.maximumf %18, %19 : vector<128x128xf32>
      %21 = arith.truncf %20 : vector<128x128xf32> to vector<128x128xbf16>
      %c0_14 = arith.constant 0 : index
      %c0_15 = arith.constant 0 : index
      %22 = vector.load %arg5[%c0_14, %c0_15] : memref<128x128xbf16, #tpu.memory_space<vmem>>, vector<128x128xbf16>
      %cst_16 = arith.constant dense<0.000000e+00> : vector<128x128xf32>
      %23 = tpu.matmul %21, %22, %cst_16 {dimension_numbers = #tpu.dot_dimension_numbers<[1], [0], [0], [1], [0, 0, 1, 1], [], []>} : vector<128x128xbf16>, vector<128x128xbf16>, vector<128x128xf32> -> vector<128x128xf32>
      %24 = arith.truncf %23 : vector<128x128xf32> to vector<128x128xbf16>
      %c0_17 = arith.constant 0 : index
      %c0_18 = arith.constant 0 : index
      %25 = vector.load %arg6[%c0_17, %c0_18] : memref<128x128xbf16, #tpu.memory_space<vmem>>, vector<128x128xbf16>
      tpu.vector_store %arg6[%c0_17, %c0_18], %24 {strides = array<i32>} : memref<128x128xbf16, #tpu.memory_space<vmem>>, vector<128x128xbf16>,
    } else {
    }
    return
  }
  func.func @transform_0(%arg0: i32, %arg1: i32) -> (i32, i32) {
    %c0_i32 = arith.constant 0 : i32
    return %arg0, %arg1 : i32, i32
  }
  func.func @transform_1(%arg0: i32, %arg1: i32) -> (i32, i32) {
    %c0_i32 = arith.constant 0 : i32
    %c0_i32_0 = arith.constant 0 : i32
    %c0_i32_1 = arith.constant 0 : i32
    return %c0_i32, %c0_i32_0 : i32, i32
  }
  func.func @transform_2(%arg0: i32, %arg1: i32) -> (i32, i32) {
    %c0_i32 = arith.constant 0 : i32
    %c0_i32_0 = arith.constant 0 : i32
    %c0_i32_1 = arith.constant 0 : i32
    return %c0_i32, %c0_i32_0 : i32, i32
  }
  func.func @transform_3(%arg0: i32, %arg1: i32) -> (i32, i32) {
    %c0_i32 = arith.constant 0 : i32
    %c0_i32_0 = arith.constant 0 : i32
    %c0_i32_1 = arith.constant 0 : i32
    return %c0_i32, %c0_i32_0 : i32, i32
  }
  func.func @transform_4(%arg0: i32, %arg1: i32) -> (i32, i32) {
    %c0_i32 = arith.constant 0 : i32
    %c0_i32_0 = arith.constant 0 : i32
    return %arg0, %c0_i32 : i32, i32
  }
}

</mosaic_0001>

<bundles_post_ra>
// kernel: variational_gcn_encoder.3
= control target key start
LH: loop header
LB: loop body
LE: loop exit
PB: predicated region body
PF: predicated region fallthrough
CT: control target
= control target key end

     0   :  { %s593_s1 = inlined_call_operand.vmem [shape: bf16[128,128], index: 1, kind: input, shape index: {}]   ;;  %s594_s0 = inlined_call_operand.vmem [shape: bf16[128,128], index: 0, kind: input, shape index: {}]   ;;  %s595_s2 = inlined_call_operand.vmem [shape: f32[1,128], index: 2, kind: input, shape index: {}]   ;;  %s596_s3 = inlined_call_operand.vmem [shape: f32[128,128], index: 3, kind: output, shape index: {}]  }
   0x1   :  { %v458_v0 = vld [vmem:[%s593_s1 + $0x38] sm:$0xff]   ;;  %v459_v1 = vld [vmem:[%s593_s1 + $0x30] sm:$0xff]   ;;  %v460_v2 = vld [vmem:[%s593_s1 + $0x28] sm:$0xff]  }
   0x2   :  { %410 = vmatprep.subr.bf16.mxu0 %v458_v0  ;;  %442 = vmatprep.subr.bf16.mxu1 %v458_v0  ;;  %v461_v3 = vld [vmem:[%s593_s1 + $0x20] sm:$0xff]   ;;  %v462_v6 = vld [vmem:[%s593_s1 + $0x18] sm:$0xff]   ;;  %v463_v7 = vld [vmem:[%s593_s1 + $0x10] sm:$0xff]  }
   0x3   :  { %411 = vmatpush3.bf16.msra.mxu0 %v458_v0  ;;  %450 = vmatpush3.bf16.msra.mxu1 %v458_v0  ;;  %v466_v4 = vld [vmem:[%s594_s0] sm:$0xff]   ;;  %v464_v8 = vld [vmem:[%s593_s1 + $0x8] sm:$0xff]   ;;  %v470_v12 = vld [vmem:[%s594_s0 + $0x10] sm:$0xff]  }
   0x4   :  { %412 = vmatprep.subr.bf16.mxu0 %v459_v1  ;;  %443 = vmatprep.subr.bf16.mxu1 %v459_v1  ;;  %v467_v5 = vld [vmem:[%s594_s0 + $0x20] sm:$0xff]   ;;  %v468_v10 = vld [vmem:[%s594_s0 + $0x8] sm:$0xff]   ;;  %v471_v13 = vld [vmem:[%s594_s0 + $0x30] sm:$0xff]  }
   0x5   :  { %426 = vmatprep.mubr.bf16.mxu0 %v466_v4  ;;  %434 = vmatprep.mubr.bf16.mxu1 %v467_v5  ;;  %v465_v9 = vld [vmem:[%s593_s1] sm:$0xff]   ;;  %v469_v11 = vld [vmem:[%s594_s0 + $0x28] sm:$0xff]   ;;  %v472_v14 = vld [vmem:[%s594_s0 + $0x18] sm:$0xff]  }
   0x6   :  { %v473_v15 = vld [vmem:[%s594_s0 + $0x38] sm:$0xff]   ;;  %v393_v16 = vld [vmem:[%s595_s2] ss:$0 sm:$0xff] }
   0x7   :  { %413 = vmatpush3.bf16.msra.mxu0 %v459_v1  ;;  %451 = vmatpush3.bf16.msra.mxu1 %v459_v1 }
   0x8   :  { %414 = vmatprep.subr.bf16.mxu0 %v460_v2  ;;  %444 = vmatprep.subr.bf16.mxu1 %v460_v2 }
   0xb   :  { %415 = vmatpush3.bf16.msra.mxu0 %v460_v2  ;;  %452 = vmatpush3.bf16.msra.mxu1 %v460_v2 }
   0xc   :  { %416 = vmatprep.subr.bf16.mxu0 %v461_v3  ;;  %445 = vmatprep.subr.bf16.mxu1 %v461_v3 }
   0xf   :  { %417 = vmatpush3.bf16.msra.mxu0 %v461_v3  ;;  %453 = vmatpush3.bf16.msra.mxu1 %v461_v3 }
  0x10   :  { %418 = vmatprep.subr.bf16.mxu0 %v462_v6  ;;  %446 = vmatprep.subr.bf16.mxu1 %v462_v6 }
  0x13   :  { %419 = vmatpush3.bf16.msra.mxu0 %v462_v6  ;;  %454 = vmatpush3.bf16.msra.mxu1 %v462_v6 }
  0x14   :  { %420 = vmatprep.subr.bf16.mxu0 %v463_v7  ;;  %447 = vmatprep.subr.bf16.mxu1 %v463_v7 }
  0x17   :  { %421 = vmatpush3.bf16.msra.mxu0 %v463_v7  ;;  %455 = vmatpush3.bf16.msra.mxu1 %v463_v7 }
  0x18   :  { %422 = vmatprep.subr.bf16.mxu0 %v464_v8  ;;  %448 = vmatprep.subr.bf16.mxu1 %v464_v8 }
  0x1b   :  { %423 = vmatpush3.bf16.msra.mxu0 %v464_v8  ;;  %456 = vmatpush3.bf16.msra.mxu1 %v464_v8 }
  0x1c   :  { %424 = vmatprep.subr.bf16.mxu0 %v465_v9  ;;  %449 = vmatprep.subr.bf16.mxu1 %v465_v9 }
  0x1f   :  { %425 = vmatpush3.bf16.msra.mxu0 %v465_v9  ;;  %457 = vmatpush3.bf16.msra.mxu1 %v465_v9 }
  0x22   :  { %427 = vmatmul.mubr.bf16.vlgmr.msra.gmra.mxu0 %v468_v10  ;;  %435 = vmatmul.mubr.bf16.vlgmr.msra.gmra.mxu1 %v469_v11 }
  0x23   :  { %430 = vmatprep.mubr.bf16.mxu0 %v470_v12  ;;  %438 = vmatprep.mubr.bf16.mxu1 %v471_v13 }
  0x2a   :  { %431 = vmatmul.mubr.bf16.gmra.mxu0 %v472_v14  ;;  %439 = vmatmul.mubr.bf16.gmra.mxu1 %v473_v15 }
  0xe2   :  { %v428_v17 = vpop.f32.mrf.mxu0  ;;  %v436_v18 = vpop.f32.mrf.mxu1 }
  0xe3   :  { %v341_v19 = vadd.f32 %v428_v17, %v393_v16  ;;  %v349_v20 = vadd.f32 %v436_v18, %v393_v16 }
  0xe4   :  { %v218_v21 = vpop.f32.mrf.mxu0  ;;  %v250_v22 = vpop.f32.mrf.mxu1 }
  0xe5   :  { %357 = vst [vmem:[%s596_s3 + $0x10] sm:$0xff] %v341_v19  ;;  %365 = vst [vmem:[%s596_s3 + $0x50] sm:$0xff] %v349_v20  ;;  %v339_v23 = vadd.f32 %v393_v16, %v218_v21  ;;  %v347_v24 = vadd.f32 %v393_v16, %v250_v22 }
  0xe6   :  { %v429_v25 = vpop.f32.mrf.mxu0  ;;  %v437_v26 = vpop.f32.mrf.mxu1 }
  0xe7   :  { %355 = vst [vmem:[%s596_s3] sm:$0xff] %v339_v23  ;;  %363 = vst [vmem:[%s596_s3 + $0x40] sm:$0xff] %v347_v24  ;;  %v342_v27 = vadd.f32 %v429_v25, %v393_v16  ;;  %v350_v28 = vadd.f32 %v437_v26, %v393_v16 }
  0xe8   :  { %v221_v29 = vpop.f32.mrf.mxu0  ;;  %v253_v30 = vpop.f32.mrf.mxu1 }
  0xe9   :  { %358 = vst [vmem:[%s596_s3 + $0x18] sm:$0xff] %v342_v27  ;;  %366 = vst [vmem:[%s596_s3 + $0x58] sm:$0xff] %v350_v28  ;;  %v340_v31 = vadd.f32 %v393_v16, %v221_v29  ;;  %v348_v32 = vadd.f32 %v393_v16, %v253_v30 }
  0xea   :  { %v432_v33 = vpop.f32.mrf.mxu0  ;;  %v440_v34 = vpop.f32.mrf.mxu1 }
  0xeb   :  { %356 = vst [vmem:[%s596_s3 + $0x8] sm:$0xff] %v340_v31  ;;  %364 = vst [vmem:[%s596_s3 + $0x48] sm:$0xff] %v348_v32  ;;  %v345_v35 = vadd.f32 %v432_v33, %v393_v16  ;;  %v353_v36 = vadd.f32 %v440_v34, %v393_v16 }
  0xec   :  { %v234_v37 = vpop.f32.mrf.mxu0  ;;  %v266_v38 = vpop.f32.mrf.mxu1 }
  0xed   :  { %361 = vst [vmem:[%s596_s3 + $0x30] sm:$0xff] %v345_v35  ;;  %369 = vst [vmem:[%s596_s3 + $0x70] sm:$0xff] %v353_v36  ;;  %v343_v39 = vadd.f32 %v393_v16, %v234_v37  ;;  %v351_v40 = vadd.f32 %v393_v16, %v266_v38 }
  0xee   :  { %v433_v41 = vpop.f32.mrf.mxu0  ;;  %v441_v42 = vpop.f32.mrf.mxu1 }
  0xef   :  { %359 = vst [vmem:[%s596_s3 + $0x20] sm:$0xff] %v343_v39  ;;  %367 = vst [vmem:[%s596_s3 + $0x60] sm:$0xff] %v351_v40  ;;  %v346_v43 = vadd.f32 %v433_v41, %v393_v16  ;;  %v354_v44 = vadd.f32 %v441_v42, %v393_v16 }
  0xf0   :  { %v237_v45 = vpop.f32.mrf.mxu0  ;;  %v269_v46 = vpop.f32.mrf.mxu1 }
  0xf1   :  { %362 = vst [vmem:[%s596_s3 + $0x38] sm:$0xff] %v346_v43  ;;  %370 = vst [vmem:[%s596_s3 + $0x78] sm:$0xff] %v354_v44  ;;  %v344_v47 = vadd.f32 %v393_v16, %v237_v45  ;;  %v352_v48 = vadd.f32 %v393_v16, %v269_v46 }
  0xf3   :  { %360 = vst [vmem:[%s596_s3 + $0x28] sm:$0xff] %v344_v47  ;;  %368 = vst [vmem:[%s596_s3 + $0x68] sm:$0xff] %v352_v48 }

// kernel: variational_gcn_encoder.2
= control target key start
LH: loop header
LB: loop body
LE: loop exit
PB: predicated region body
PF: predicated region fallthrough
CT: control target
= control target key end

     0   :  { %s977_s1 = inlined_call_operand.vmem [shape: bf16[128,128], index: 1, kind: input, shape index: {}]   ;;  %s978_s0 = inlined_call_operand.vmem [shape: bf16[128,128], index: 0, kind: input, shape index: {}]   ;;  %s979_s3 = inlined_call_operand.vmem [shape: bf16[128,128], index: 3, kind: input, shape index: {}]   ;;  %s980_s2 = inlined_call_operand.vmem [shape: f32[1,128], index: 2, kind: input, shape index: {}]   ;;  %s981_s4 = inlined_call_operand.vmem [shape: bf16[128,128], index: 4, kind: output, shape index: {}]  }
   0x1   :  { %v829_v0 = vld [vmem:[%s977_s1 + $0x38] sm:$0xff]   ;;  %v830_v1 = vld [vmem:[%s977_s1 + $0x30] sm:$0xff]   ;;  %v831_v2 = vld [vmem:[%s977_s1 + $0x28] sm:$0xff]  }
   0x2   :  { %765 = vmatprep.subr.bf16.mxu0 %v829_v0  ;;  %v832_v3 = vld [vmem:[%s977_s1 + $0x20] sm:$0xff]   ;;  %v833_v5 = vld [vmem:[%s977_s1 + $0x18] sm:$0xff]   ;;  %v834_v6 = vld [vmem:[%s977_s1 + $0x10] sm:$0xff]  }
   0x3   :  { %766 = vmatpush3.bf16.msra.mxu0 %v829_v0  ;;  %v837_v4 = vld [vmem:[%s978_s0] sm:$0xff]   ;;  %v845_v7 = vld [vmem:[%s979_s3 + $0x38] sm:$0xff]   ;;  %v846_v8 = vld [vmem:[%s979_s3 + $0x30] sm:$0xff]  }
   0x4   :  { %767 = vmatprep.subr.bf16.mxu0 %v830_v1  ;;  %781 = vmatprep.mubr.bf16.mxu0 %v837_v4  ;;  %v835_v9 = vld [vmem:[%s977_s1 + $0x8] sm:$0xff]   ;;  %v836_v11 = vld [vmem:[%s977_s1] sm:$0xff]   ;;  %v849_v13 = vld [vmem:[%s979_s3 + $0x18] sm:$0xff]  }
   0x5   :  { %797 = vmatprep.subr.bf16.mxu1 %v845_v7  ;;  %v847_v10 = vld [vmem:[%s979_s3 + $0x28] sm:$0xff]   ;;  %v848_v12 = vld [vmem:[%s979_s3 + $0x20] sm:$0xff]   ;;  %v839_v15 = vld [vmem:[%s978_s0 + $0x10] sm:$0xff]  }
   0x6   :  { %798 = vmatpush3.bf16.msra.mxu1 %v845_v7  ;;  %v838_v14 = vld [vmem:[%s978_s0 + $0x8] sm:$0xff]   ;;  %v840_v16 = vld [vmem:[%s978_s0 + $0x18] sm:$0xff]   ;;  %v841_v17 = vld [vmem:[%s978_s0 + $0x20] sm:$0xff]  }
   0x7   :  { %768 = vmatpush3.bf16.msra.mxu0 %v830_v1  ;;  %799 = vmatprep.subr.bf16.mxu1 %v846_v8  ;;  %v842_v18 = vld [vmem:[%s978_s0 + $0x28] sm:$0xff]   ;;  %v843_v19 = vld [vmem:[%s978_s0 + $0x30] sm:$0xff]   ;;  %v844_v20 = vld [vmem:[%s978_s0 + $0x38] sm:$0xff]  }
   0x8   :  { %769 = vmatprep.subr.bf16.mxu0 %v831_v2  ;;  %v850_v21 = vld [vmem:[%s979_s3 + $0x10] sm:$0xff]   ;;  %v851_v22 = vld [vmem:[%s979_s3 + $0x8] sm:$0xff]   ;;  %v852_v23 = vld [vmem:[%s979_s3] sm:$0xff]  }
   0x9   :  { %v645_v26 = vld [vmem:[%s980_s2] ss:$0 sm:$0xff] }
   0xa   :  { %800 = vmatpush3.bf16.msra.mxu1 %v846_v8 }
   0xb   :  { %770 = vmatpush3.bf16.msra.mxu0 %v831_v2  ;;  %801 = vmatprep.subr.bf16.mxu1 %v847_v10 }
   0xc   :  { %771 = vmatprep.subr.bf16.mxu0 %v832_v3 }
   0xe   :  { %802 = vmatpush3.bf16.msra.mxu1 %v847_v10 }
   0xf   :  { %772 = vmatpush3.bf16.msra.mxu0 %v832_v3  ;;  %803 = vmatprep.subr.bf16.mxu1 %v848_v12 }
  0x10   :  { %773 = vmatprep.subr.bf16.mxu0 %v833_v5 }
  0x12   :  { %804 = vmatpush3.bf16.msra.mxu1 %v848_v12 }
  0x13   :  { %774 = vmatpush3.bf16.msra.mxu0 %v833_v5  ;;  %805 = vmatprep.subr.bf16.mxu1 %v849_v13 }
  0x14   :  { %775 = vmatprep.subr.bf16.mxu0 %v834_v6 }
  0x16   :  { %806 = vmatpush3.bf16.msra.mxu1 %v849_v13 }
  0x17   :  { %776 = vmatpush3.bf16.msra.mxu0 %v834_v6  ;;  %807 = vmatprep.subr.bf16.mxu1 %v850_v21 }
  0x18   :  { %777 = vmatprep.subr.bf16.mxu0 %v835_v9 }
  0x1a   :  { %808 = vmatpush3.bf16.msra.mxu1 %v850_v21 }
  0x1b   :  { %778 = vmatpush3.bf16.msra.mxu0 %v835_v9  ;;  %809 = vmatprep.subr.bf16.mxu1 %v851_v22 }
  0x1c   :  { %779 = vmatprep.subr.bf16.mxu0 %v836_v11 }
  0x1e   :  { %810 = vmatpush3.bf16.msra.mxu1 %v851_v22 }
  0x1f   :  { %780 = vmatpush3.bf16.msra.mxu0 %v836_v11  ;;  %811 = vmatprep.subr.bf16.mxu1 %v852_v23 }
  0x22   :  { %782 = vmatmul.mubr.bf16.vlgmr.msra.gmra.mxu0 %v838_v14  ;;  %812 = vmatpush3.bf16.msra.mxu1 %v852_v23 }
  0x23   :  { %785 = vmatprep.mubr.bf16.mxu0 %v839_v15 }
  0x2a   :  { %786 = vmatmul.mubr.bf16.gmra.mxu0 %v840_v16 }
  0x2b   :  { %789 = vmatprep.mubr.bf16.mxu0 %v841_v17 }
  0x32   :  { %790 = vmatmul.mubr.bf16.gmra.mxu0 %v842_v18 }
  0x33   :  { %793 = vmatprep.mubr.bf16.mxu0 %v843_v19 }
  0x3a   :  { %794 = vmatmul.mubr.bf16.gmra.mxu0 %v844_v20 }
  0xe2   :  { %v783_v24 = vpop.f32.mrf.mxu0 }
  0xe3   :  { %v344_v30 = vadd.f32 %v783_v24, %v645_v26 }
  0xe4   :  { %v221_v25 = vpop.f32.mrf.mxu0 }
  0xe5   :  { %v342_v28 = vadd.f32 %v645_v26, %v221_v25  ;;  %v360_v37 = vmax.f32 %v344_v30, 0.0 }
  0xe6   :  { %v784_v27 = vpop.f32.mrf.mxu0 }
  0xe7   :  { %v345_v29 = vadd.f32 %v784_v27, %v645_v26  ;;  %v358_v35 = vmax.f32 %v342_v28, 0.0 }
  0xe8   :  { %v224_v31 = vpop.f32.mrf.mxu0 }
  0xe9   :  { %v343_v32 = vadd.f32 %v645_v26, %v224_v31  ;;  %v361_v33 = vmax.f32 %v345_v29, 0.0 }
  0xea   :  { %v787_v34 = vpop.f32.mrf.mxu0 }
  0xeb   :  { %v359_v36 = vmax.f32 %v343_v32, 0.0  ;;  %v375_v40 = vpack.c.bf16 %v361_v33, %v360_v37  ;;  %v348_v44 = vadd.f32 %v787_v34, %v645_v26 }
  0xec   :  { %v237_v38 = vpop.f32.mrf.mxu0 }
  0xed   :  { %v374_v39 = vpack.c.bf16 %v359_v36, %v358_v35  ;;  %v346_v42 = vadd.f32 %v645_v26, %v237_v38  ;;  %v364_v51 = vmax.f32 %v348_v44, 0.0 }
  0xee   :  { %v788_v41 = vpop.f32.mrf.mxu0 }
  0xef   :  { %v349_v43 = vadd.f32 %v788_v41, %v645_v26  ;;  %813 = vmatprep.mubr.bf16.mxu1 %v374_v39  ;;  %v362_v49 = vmax.f32 %v346_v42, 0.0 }
  0xf0   :  { %v240_v45 = vpop.f32.mrf.mxu0  ;;  %814 = vmatmul.mubr.bf16.vlgmr.msra.gmra.mxu1 %v375_v40 }
  0xf1   :  { %v347_v46 = vadd.f32 %v645_v26, %v240_v45  ;;  %v365_v47 = vmax.f32 %v349_v43, 0.0 }
  0xf2   :  { %v791_v48 = vpop.f32.mrf.mxu0 }
  0xf3   :  { %v363_v50 = vmax.f32 %v347_v46, 0.0  ;;  %v377_v54 = vpack.c.bf16 %v365_v47, %v364_v51  ;;  %v352_v58 = vadd.f32 %v791_v48, %v645_v26 }
  0xf4   :  { %v253_v52 = vpop.f32.mrf.mxu0 }
  0xf5   :  { %v376_v53 = vpack.c.bf16 %v363_v50, %v362_v49  ;;  %v350_v56 = vadd.f32 %v645_v26, %v253_v52  ;;  %v368_v1 = vmax.f32 %v352_v58, 0.0 }
  0xf6   :  { %v792_v55 = vpop.f32.mrf.mxu0 }
  0xf7   :  { %v353_v57 = vadd.f32 %v792_v55, %v645_v26  ;;  %817 = vmatprep.mubr.bf16.mxu1 %v376_v53  ;;  %v366_v63 = vmax.f32 %v350_v56, 0.0 }
  0xf8   :  { %v256_v59 = vpop.f32.mrf.mxu0  ;;  %818 = vmatmul.mubr.bf16.gmra.mxu1 %v377_v54 }
  0xf9   :  { %v351_v60 = vadd.f32 %v645_v26, %v256_v59  ;;  %v369_v61 = vmax.f32 %v353_v57, 0.0 }
  0xfa   :  { %v795_v62 = vpop.f32.mrf.mxu0 }
  0xfb   :  { %v367_v0 = vmax.f32 %v351_v60, 0.0  ;;  %v379_v4 = vpack.c.bf16 %v369_v61, %v368_v1  ;;  %v356_v8 = vadd.f32 %v795_v62, %v645_v26 }
  0xfc   :  { %v269_v2 = vpop.f32.mrf.mxu0 }
  0xfd   :  { %v378_v3 = vpack.c.bf16 %v367_v0, %v366_v63  ;;  %v354_v6 = vadd.f32 %v645_v26, %v269_v2  ;;  %v372_v14 = vmax.f32 %v356_v8, 0.0 }
  0xfe   :  { %v796_v5 = vpop.f32.mrf.mxu0 }
  0xff   :  { %v357_v7 = vadd.f32 %v796_v5, %v645_v26  ;;  %821 = vmatprep.mubr.bf16.mxu1 %v378_v3  ;;  %v370_v12 = vmax.f32 %v354_v6, 0.0 }
 0x100   :  { %v272_v9 = vpop.f32.mrf.mxu0  ;;  %822 = vmatmul.mubr.bf16.gmra.mxu1 %v379_v4 }
 0x101   :  { %v355_v10 = vadd.f32 %v645_v26, %v272_v9  ;;  %v373_v11 = vmax.f32 %v357_v7, 0.0 }
 0x103   :  { %v371_v13 = vmax.f32 %v355_v10, 0.0  ;;  %v381_v16 = vpack.c.bf16 %v373_v11, %v372_v14 }
 0x105   :  { %v380_v15 = vpack.c.bf16 %v371_v13, %v370_v12 }
 0x107   :  { %825 = vmatprep.mubr.bf16.mxu1 %v380_v15 }
 0x108   :  { %826 = vmatmul.mubr.bf16.gmra.mxu1 %v381_v16 }
 0x1b0   :  { %v815_v17 = vpop.f32.mrf.mxu1 }
 0x1b2   :  { %v480_v18 = vpop.f32.mrf.mxu1 }
 0x1b4   :  { %v816_v19 = vpop.f32.mrf.mxu1 }
 0x1b5   :  { %v694_v20 = vpack.c.bf16 %v816_v19, %v815_v17 }
 0x1b6   :  { %v483_v21 = vpop.f32.mrf.mxu1 }
 0x1b7   :  { %726 = vst [vmem:[%s981_s4 + $0x8] sm:$0xff] %v694_v20   ;;  %v689_v22 = vpack.c.bf16 %v483_v21, %v480_v18 }
 0x1b8   :  { %v819_v23 = vpop.f32.mrf.mxu1 }
 0x1b9   :  { %690 = vst [vmem:[%s981_s4] sm:$0xff] %v689_v22  }
 0x1ba   :  { %v496_v24 = vpop.f32.mrf.mxu1 }
 0x1bc   :  { %v820_v25 = vpop.f32.mrf.mxu1 }
 0x1bd   :  { %v704_v26 = vpack.c.bf16 %v820_v25, %v819_v23 }
 0x1be   :  { %v499_v27 = vpop.f32.mrf.mxu1 }
 0x1bf   :  { %728 = vst [vmem:[%s981_s4 + $0x18] sm:$0xff] %v704_v26   ;;  %v699_v28 = vpack.c.bf16 %v499_v27, %v496_v24 }
 0x1c0   :  { %v823_v29 = vpop.f32.mrf.mxu1 }
 0x1c1   :  { %727 = vst [vmem:[%s981_s4 + $0x10] sm:$0xff] %v699_v28  }
 0x1c2   :  { %v512_v30 = vpop.f32.mrf.mxu1 }
 0x1c4   :  { %v824_v31 = vpop.f32.mrf.mxu1 }
 0x1c5   :  { %v714_v32 = vpack.c.bf16 %v824_v31, %v823_v29 }
 0x1c6   :  { %v515_v33 = vpop.f32.mrf.mxu1 }
 0x1c7   :  { %730 = vst [vmem:[%s981_s4 + $0x28] sm:$0xff] %v714_v32   ;;  %v709_v34 = vpack.c.bf16 %v515_v33, %v512_v30 }
 0x1c8   :  { %v827_v35 = vpop.f32.mrf.mxu1 }
 0x1c9   :  { %729 = vst [vmem:[%s981_s4 + $0x20] sm:$0xff] %v709_v34  }
 0x1ca   :  { %v528_v36 = vpop.f32.mrf.mxu1 }
 0x1cc   :  { %v828_v37 = vpop.f32.mrf.mxu1 }
 0x1cd   :  { %v724_v38 = vpack.c.bf16 %v828_v37, %v827_v35 }
 0x1ce   :  { %v531_v39 = vpop.f32.mrf.mxu1 }
 0x1cf   :  { %732 = vst [vmem:[%s981_s4 + $0x38] sm:$0xff] %v724_v38   ;;  %v719_v40 = vpack.c.bf16 %v531_v39, %v528_v36 }
 0x1d1   :  { %731 = vst [vmem:[%s981_s4 + $0x30] sm:$0xff] %v719_v40  }

</bundles_post_ra>
